<compile_context>
chip_gen: v5e
topology: v5e:2x2
jax: 0.10.0
libtpu: 0.0.40
codegen_flags: <defaults>
</compile_context>

<pallas_src>
import jax
import jax.numpy as jnp
from jax.experimental import pallas as pl
from jax.experimental.pallas import tpu as pltpu


def _round_up(x, m):
    return ((x + m - 1) // m) * m


def _rgcn_kernel(a_ref, x_ref, ddst_ref, w_ref, bsum_ref, o_ref, agg_ref):
    """One grid step of the fused RGCN aggregation for one destination type.

    a_ref    : (1, tm, tk)        bf16  raw 0/1 adjacency tile of relation r
    x_ref    : (1, tk, F_pad)     bf16  deg_src^-1/2-scaled source features of r
    ddst_ref : (1, tm, 1)         f32   deg_dst^-1/2 of relation r
    w_ref    : (1, F_pad, F_pad)  f32   GraphConv weight of relation r
    bsum_ref : (1, F_pad)         f32   sum of biases over relations of this dst
    o_ref    : (tm, F_pad)        f32   output block, resident across (r, k)
    agg_ref  : (tm, F_pad)        f32   scratch: running A_r @ X_r over k tiles
    """
    r = pl.program_id(1)
    k = pl.program_id(2)
    nr = pl.num_programs(1)
    nk = pl.num_programs(2)

    @pl.when(jnp.logical_and(r == 0, k == 0))
    def _():
        o_ref[...] = jnp.zeros_like(o_ref)

    @pl.when(k == 0)
    def _():
        agg_ref[...] = jnp.zeros_like(agg_ref)

    # Dominant matmul: bf16 operands on the MXU, f32 accumulation.
    agg_ref[...] += jnp.dot(a_ref[0], x_ref[0],
                            preferred_element_type=jnp.float32)

    @pl.when(k == nk - 1)
    def _():
        # dst-side normalization + per-relation projection, summed over
        # relations directly into the resident output block (aggregate='sum').
        o_ref[...] += jnp.dot(agg_ref[...] * ddst_ref[0], w_ref[0],
                              preferred_element_type=jnp.float32)

    @pl.when(jnp.logical_and(r == nr - 1, k == nk - 1))
    def _():
        o_ref[...] += bsum_ref[...]


def hetero_conv_dst(a_stack, x_stack, ddst_stack, w_stack, bias_sum,
                    *, tm, tk, vmem_limit_bytes):
    """sum_r (diag(ddst_r) @ A_r @ X_scaled_r) @ W_r  + sum_r b_r  (one dst type).

    a_stack    : [R, N_dst_p, N_src_p] bf16   raw 0/1 adjacency (zero padded)
    x_stack    : [R, N_src_p, F_pad]   bf16   deg_src^-1/2-scaled features
    ddst_stack : [R, N_dst_p, 1]       f32    deg_dst^-1/2
    w_stack    : [R, F_pad, F_pad]     f32
    bias_sum   : [1, F_pad]            f32    sum of biases over relations
    """
    R, n_dst_p, n_src_p = a_stack.shape
    f_pad = x_stack.shape[-1]
    grid = (n_dst_p // tm, R, n_src_p // tk)

    return pl.pallas_call(
        _rgcn_kernel,
        out_shape=jax.ShapeDtypeStruct((n_dst_p, f_pad), jnp.float32),
        grid_spec=pltpu.PrefetchScalarGridSpec(
            num_scalar_prefetch=0,
            grid=grid,
            in_specs=[
                pl.BlockSpec((1, tm, tk), lambda i, r, k: (r, i, k)),
                pl.BlockSpec((1, tk, f_pad), lambda i, r, k: (r, k, 0)),
                pl.BlockSpec((1, tm, 1), lambda i, r, k: (r, i, 0)),
                pl.BlockSpec((1, f_pad, f_pad), lambda i, r, k: (r, 0, 0)),
                pl.BlockSpec((1, f_pad), lambda i, r, k: (0, 0)),
            ],
            out_specs=pl.BlockSpec((tm, f_pad), lambda i, r, k: (i, 0)),
            scratch_shapes=[pltpu.VMEM((tm, f_pad), jnp.float32)],
        ),
        compiler_params=pltpu.CompilerParams(
            # N_dst-tile axis shards across TensorCores on v7x; (r, k) are
            # reductions into the resident output block.
            dimension_semantics=("parallel", "arbitrary", "arbitrary"),
            vmem_limit_bytes=vmem_limit_bytes,
        ),
    )(a_stack, x_stack, ddst_stack, w_stack, bias_sum)


def rgcn_layer_forward(features, adjs, params, relations,
                       *, tm_target=256, tk_target=512):
    """HeteroGraphConv(aggregate='sum') forward.

    features : dict node_type -> [N, F_in]            (f32)
    adjs     : dict etype -> raw 0/1 adjacency [N_dst, N_src]  (f32)
    params   : dict etype -> (W [F_in, F_out], b [F_out])
    relations: list of (src_type, etype, dst_type), sorted by etype.
    """
    dst_types = sorted({d for _, _, d in relations})
    out = {}
    for dst in dst_types:
        rels = [(s, e, d) for (s, e, d) in relations if d == dst]
        n_dst = adjs[rels[0][1]].shape[0]
        f_in = features[rels[0][0]].shape[1]
        f_out = params[rels[0][1]][0].shape[1]
        f_pad = _round_up(max(f_in, f_out), 128)   # lane-dense output stores

        # Destination tile size (rows of A / output).
        if n_dst <= tm_target:
            tm, n_dst_p = n_dst, n_dst
        else:
            tm, n_dst_p = tm_target, _round_up(n_dst, tm_target)

        # Source tile size (lane axis of A); common padded N_src across rels.
        n_src_max = max(adjs[e].shape[1] for _, e, _ in rels)
        if n_src_max <= tk_target:
            tk, n_src_p = n_src_max, n_src_max
        else:
            tk, n_src_p = tk_target, _round_up(n_src_max, tk_target)

        a_list, x_list, dd_list, w_list, b_list = [], [], [], [], []
        for s, e, _ in rels:
            a = adjs[e].astype(jnp.float32)                 # raw 0/1
            n_src = a.shape[1]
            deg_src = jnp.clip(a.sum(axis=0), 1.0, None)    # out-degree of src
            deg_dst = jnp.clip(a.sum(axis=1), 1.0, None)    # in-degree of dst

            # Raw adjacency kept narrow (bf16, 0/1 values exact) -- the degree
            # scales are applied to X (src side) and in-kernel (dst side).
            a_p = jnp.zeros((n_dst_p, n_src_p), jnp.bfloat16)
            a_p = a_p.at[:n_dst, :n_src].set(a.astype(jnp.bfloat16))

            x_scaled = features[s] * (deg_src[:, None] ** -0.5)
            x_p = jnp.zeros((n_src_p, f_pad), jnp.bfloat16)
            x_p = x_p.at[:n_src, :f_in].set(x_scaled.astype(jnp.bfloat16))

            dd_p = jnp.zeros((n_dst_p, 1), jnp.float32)
            dd_p = dd_p.at[:n_dst, 0].set(deg_dst ** -0.5)

            w, b = params[e]
            w_p = jnp.zeros((f_pad, f_pad), jnp.float32)
            w_p = w_p.at[:f_in, :f_out].set(w.astype(jnp.float32))

            a_list.append(a_p)
            x_list.append(x_p)
            dd_list.append(dd_p)
            w_list.append(w_p)
            b_list.append(b.astype(jnp.float32))

        a_stack = jnp.stack(a_list)
        x_stack = jnp.stack(x_list)
        dd_stack = jnp.stack(dd_list)
        w_stack = jnp.stack(w_list)
        bias_sum = jnp.zeros((1, f_pad), jnp.float32).at[0, :f_out].set(
            jnp.sum(jnp.stack(b_list), axis=0))

        # Explicit VMEM budget (double-buffered inputs + resident out + scratch),
        # raised above the conservative defaults but capped safely for v7x.
        vmem_est = (2 * (tm * tk * 2 + tk * f_pad * 2 + tm * 4
                         + f_pad * f_pad * 4 + f_pad * 4 + tm * f_pad * 4)
                    + tm * f_pad * 4)
        vmem_limit = int(max(32 * 1024 * 1024,
                             min(2 * vmem_est, 48 * 1024 * 1024)))

        y = hetero_conv_dst(a_stack, x_stack, dd_stack, w_stack, bias_sum,
                            tm=tm, tk=tk, vmem_limit_bytes=vmem_limit)
        out[dst] = y[:n_dst, :f_out]
    return out


def rgcn_layer_reference(features, adjs, params, relations):
    """Pure-JAX f32 reference for correctness checking."""
    out = {}
    for src, ety, dst in relations:
        a = adjs[ety].astype(jnp.float32)
        deg_src = jnp.clip(a.sum(axis=0), 1.0, None)
        deg_dst = jnp.clip(a.sum(axis=1), 1.0, None)
        a_hat = a * (deg_dst[:, None] ** -0.5) * (deg_src[None, :] ** -0.5)
        w, b = params[ety]
        y = (a_hat @ features[src]) @ w + b
        out[dst] = out.get(dst, 0.0) + y
    return out


if __name__ == "__main__":
    key = jax.random.PRNGKey(0)

    # Small synthetic heterogeneous graph:
    #   node types: 'user' (16 nodes), 'item' (16 nodes)
    #   edge types (sorted): 'follows' (user->user), 'likes' (user->item),
    #                        'rev_likes' (item->user)
    N = 16
    F_IN, F_OUT = 32, 32
    relations = [
        ("user", "follows", "user"),
        ("user", "likes", "item"),
        ("item", "rev_likes", "user"),
    ]

    k_adj, k_feat, k_w, k_b = jax.random.split(key, 4)

    # Binary adjacency per edge type; OR with identity-like pattern so every
    # node has nonzero in/out degree (DGL GraphConv rejects zero in-degree).
    adjs = {}
    for i, (_, ety, _) in enumerate(relations):
        k = jax.random.fold_in(k_adj, i)
        a = jax.random.bernoulli(k, p=0.3, shape=(N, N)).astype(jnp.float32)
        adjs[ety] = jnp.maximum(a, jnp.eye(N, dtype=jnp.float32))

    # Deterministic parameter init per edge-type GraphConv (xavier-ish scale).
    params = {}
    for i, (_, ety, _) in enumerate(relations):
        kw = jax.random.fold_in(k_w, i)
        kb = jax.random.fold_in(k_b, i)
        w = jax.random.normal(kw, (F_IN, F_OUT), jnp.float32) * (1.0 / jnp.sqrt(F_IN))
        b = jax.random.normal(kb, (F_OUT,), jnp.float32) * 0.01
        params[ety] = (w, b)

    # Input node features.
    features = {
        "user": jax.random.normal(jax.random.fold_in(k_feat, 0), (N, F_IN), jnp.float32),
        "item": jax.random.normal(jax.random.fold_in(k_feat, 1), (N, F_IN), jnp.float32),
    }

    out = rgcn_layer_forward(features, adjs, params, relations)
    out = jax.tree_util.tree_map(jax.block_until_ready, out)

    ref = rgcn_layer_reference(features, adjs, params, relations)
    for nt in sorted(out):
        assert out[nt].shape == (N, F_OUT), (nt, out[nt].shape)
        # bf16 operands for the A@X matmul (f32 accumulation) -> relaxed tol.
        assert jnp.allclose(out[nt], ref[nt], atol=5e-2, rtol=5e-2), nt

    print("KERNEL_OK")
</pallas_src>

<mosaic_0001>
module attributes {stable_mosaic.version = 11 : i64} {
  func.func @_rgcn_kernel(%arg0: i32, %arg1: i32, %arg2: i32, %arg3: memref<1x16x16xbf16, #tpu.memory_space<vmem>>, %arg4: memref<1x16x128xbf16, #tpu.memory_space<vmem>>, %arg5: memref<1x16x1xf32, #tpu.memory_space<vmem>>, %arg6: memref<1x128x128xf32, #tpu.memory_space<vmem>>, %arg7: memref<1x128xf32, #tpu.memory_space<vmem>>, %arg8: memref<16x128xf32, #tpu.memory_space<vmem>>, %arg9: memref<16x128xf32, #tpu.memory_space<vmem>>) attributes {dimension_semantics = [#tpu.dimension_semantics<parallel>, #tpu.dimension_semantics<arbitrary>, #tpu.dimension_semantics<arbitrary>], iteration_bounds = array<i64: 1, 1, 1>, scalar_prefetch = 0 : i64, scratch_operands = 1 : i64, tpu.core_type = #tpu.core_type<tc>, window_params = [{transform_indices = @transform_0, window_bounds = array<i64: 1, 16, 16>}, {transform_indices = @transform_1, window_bounds = array<i64: 1, 16, 128>}, {transform_indices = @transform_2, window_bounds = array<i64: 1, 16, 1>}, {transform_indices = @transform_3, window_bounds = array<i64: 1, 128, 128>}, {pipeline_mode = #tpu.pipeline_mode<synchronous>, transform_indices = @transform_4, window_bounds = array<i64: 1, 128>}, {transform_indices = @transform_5, window_bounds = array<i64: 16, 128>}]} {
    %c0_i32 = arith.constant 0 : i32
    %0 = arith.cmpi eq, %arg1, %c0_i32 : i32
    %c0_i32_0 = arith.constant 0 : i32
    %1 = arith.cmpi eq, %arg2, %c0_i32_0 : i32
    %2 = arith.andi %0, %1 : i1
    %3 = arith.extui %2 : i1 to i32
    %c0_i32_1 = arith.constant 0 : i32
    %4 = arith.cmpi ne, %3, %c0_i32_1 : i32
    scf.if %4 {
      %cst_18 = arith.constant 0.000000e+00 : f32
      %24 = vector.broadcast %cst_18 : f32 to vector<16x128xf32>
      %c0_19 = arith.constant 0 : index
      %c0_20 = arith.constant 0 : index
      %25 = vector.load %arg8[%c0_19, %c0_20] : memref<16x128xf32, #tpu.memory_space<vmem>>, vector<16x128xf32>
      tpu.vector_store %arg8[%c0_19, %c0_20], %24 {strides = array<i32>} : memref<16x128xf32, #tpu.memory_space<vmem>>, vector<16x128xf32>,
    } else {
    }
    %c0_i32_2 = arith.constant 0 : i32
    %5 = arith.cmpi eq, %arg2, %c0_i32_2 : i32
    %6 = arith.extui %5 : i1 to i32
    %c0_i32_3 = arith.constant 0 : i32
    %7 = arith.cmpi ne, %6, %c0_i32_3 : i32
    scf.if %7 {
      %cst_18 = arith.constant 0.000000e+00 : f32
      %24 = vector.broadcast %cst_18 : f32 to vector<16x128xf32>
      %c0_19 = arith.constant 0 : index
      %c0_20 = arith.constant 0 : index
      %25 = vector.load %arg9[%c0_19, %c0_20] : memref<16x128xf32, #tpu.memory_space<vmem>>, vector<16x128xf32>
      tpu.vector_store %arg9[%c0_19, %c0_20], %24 {strides = array<i32>} : memref<16x128xf32, #tpu.memory_space<vmem>>, vector<16x128xf32>,
    } else {
    }
    %c0 = arith.constant 0 : index
    %c0_4 = arith.constant 0 : index
    %8 = vector.load %arg9[%c0, %c0_4] : memref<16x128xf32, #tpu.memory_space<vmem>>, vector<16x128xf32>
    %c0_5 = arith.constant 0 : index
    %c0_6 = arith.constant 0 : index
    %c0_7 = arith.constant 0 : index
    %9 = vector.load %arg3[%c0_5, %c0_6, %c0_7] : memref<1x16x16xbf16, #tpu.memory_space<vmem>>, vector<1x16x16xbf16>
    %10 = vector.shape_cast %9 : vector<1x16x16xbf16> to vector<16x16xbf16>
    %c0_8 = arith.constant 0 : index
    %c0_9 = arith.constant 0 : index
    %c0_10 = arith.constant 0 : index
    %11 = vector.load %arg4[%c0_8, %c0_9, %c0_10] : memref<1x16x128xbf16, #tpu.memory_space<vmem>>, vector<1x16x128xbf16>
    %12 = vector.shape_cast %11 : vector<1x16x128xbf16> to vector<16x128xbf16>
    %cst = arith.constant dense<0.000000e+00> : vector<16x128xf32>
    %13 = tpu.matmul %10, %12, %cst {dimension_numbers = #tpu.dot_dimension_numbers<[1], [0], [0], [1], [0, 0, 1, 1], [], []>} : vector<16x16xbf16>, vector<16x128xbf16>, vector<16x128xf32> -> vector<16x128xf32>
    %14 = arith.addf %8, %13 : vector<16x128xf32>
    %c0_11 = arith.constant 0 : index
    %c0_12 = arith.constant 0 : index
    %15 = vector.load %arg9[%c0_11, %c0_12] : memref<16x128xf32, #tpu.memory_space<vmem>>, vector<16x128xf32>
    tpu.vector_store %arg9[%c0_11, %c0_12], %14 {strides = array<i32>} : memref<16x128xf32, #tpu.memory_space<vmem>>, vector<16x128xf32>,
    %c0_i32_13 = arith.constant 0 : i32
    %16 = arith.cmpi eq, %arg2, %c0_i32_13 : i32
    %17 = arith.extui %16 : i1 to i32
    %c0_i32_14 = arith.constant 0 : i32
    %18 = arith.cmpi ne, %17, %c0_i32_14 : i32
    scf.if %18 {
      %c0_18 = arith.constant 0 : index
      %c0_19 = arith.constant 0 : index
      %24 = vector.load %arg8[%c0_18, %c0_19] : memref<16x128xf32, #tpu.memory_space<vmem>>, vector<16x128xf32>
      %c0_20 = arith.constant 0 : index
      %c0_21 = arith.constant 0 : index
      %25 = vector.load %arg9[%c0_20, %c0_21] : memref<16x128xf32, #tpu.memory_space<vmem>>, vector<16x128xf32>
      %c0_22 = arith.constant 0 : index
      %c0_23 = arith.constant 0 : index
      %c0_24 = arith.constant 0 : index
      %26 = vector.load %arg5[%c0_22, %c0_23, %c0_24] : memref<1x16x1xf32, #tpu.memory_space<vmem>>, vector<1x16x1xf32>
      %27 = vector.shape_cast %26 : vector<1x16x1xf32> to vector<16x1xf32>
      %28 = vector.broadcast %27 : vector<16x1xf32> to vector<16x128xf32>
      %29 = arith.mulf %25, %28 : vector<16x128xf32>
      %c0_25 = arith.constant 0 : index
      %c0_26 = arith.constant 0 : index
      %c0_27 = arith.constant 0 : index
      %30 = vector.load %arg6[%c0_25, %c0_26, %c0_27] : memref<1x128x128xf32, #tpu.memory_space<vmem>>, vector<1x128x128xf32>
      %31 = vector.shape_cast %30 : vector<1x128x128xf32> to vector<128x128xf32>
      %cst_28 = arith.constant dense<0.000000e+00> : vector<16x128xf32>
      %32 = tpu.matmul %29, %31, %cst_28 {dimension_numbers = #tpu.dot_dimension_numbers<[1], [0], [0], [1], [0, 0, 1, 1], [], []>} : vector<16x128xf32>, vector<128x128xf32>, vector<16x128xf32> -> vector<16x128xf32>
      %33 = arith.addf %24, %32 : vector<16x128xf32>
      %c0_29 = arith.constant 0 : index
      %c0_30 = arith.constant 0 : index
      %34 = vector.load %arg8[%c0_29, %c0_30] : memref<16x128xf32, #tpu.memory_space<vmem>>, vector<16x128xf32>
      tpu.vector_store %arg8[%c0_29, %c0_30], %33 {strides = array<i32>} : memref<16x128xf32, #tpu.memory_space<vmem>>, vector<16x128xf32>,
    } else {
    }
    %c0_i32_15 = arith.constant 0 : i32
    %19 = arith.cmpi eq, %arg1, %c0_i32_15 : i32
    %c0_i32_16 = arith.constant 0 : i32
    %20 = arith.cmpi eq, %arg2, %c0_i32_16 : i32
    %21 = arith.andi %19, %20 : i1
    %22 = arith.extui %21 : i1 to i32
    %c0_i32_17 = arith.constant 0 : i32
    %23 = arith.cmpi ne, %22, %c0_i32_17 : i32
    scf.if %23 {
      %c0_18 = arith.constant 0 : index
      %c0_19 = arith.constant 0 : index
      %24 = vector.load %arg8[%c0_18, %c0_19] : memref<16x128xf32, #tpu.memory_space<vmem>>, vector<16x128xf32>
      %c0_20 = arith.constant 0 : index
      %c0_21 = arith.constant 0 : index
      %25 = vector.load %arg7[%c0_20, %c0_21] : memref<1x128xf32, #tpu.memory_space<vmem>>, vector<1x128xf32>
      %26 = vector.broadcast %25 : vector<1x128xf32> to vector<16x128xf32>
      %27 = arith.addf %24, %26 : vector<16x128xf32>
      %c0_22 = arith.constant 0 : index
      %c0_23 = arith.constant 0 : index
      %28 = vector.load %arg8[%c0_22, %c0_23] : memref<16x128xf32, #tpu.memory_space<vmem>>, vector<16x128xf32>
      tpu.vector_store %arg8[%c0_22, %c0_23], %27 {strides = array<i32>} : memref<16x128xf32, #tpu.memory_space<vmem>>, vector<16x128xf32>,
    } else {
    }
    return
  }
  func.func @transform_0(%arg0: i32, %arg1: i32, %arg2: i32) -> (i32, i32, i32) {
    %c0_i32 = arith.constant 0 : i32
    return %arg1, %arg0, %arg2 : i32, i32, i32
  }
  func.func @transform_1(%arg0: i32, %arg1: i32, %arg2: i32) -> (i32, i32, i32) {
    %c0_i32 = arith.constant 0 : i32
    %c0_i32_0 = arith.constant 0 : i32
    return %arg1, %arg2, %c0_i32 : i32, i32, i32
  }
  func.func @transform_2(%arg0: i32, %arg1: i32, %arg2: i32) -> (i32, i32, i32) {
    %c0_i32 = arith.constant 0 : i32
    %c0_i32_0 = arith.constant 0 : i32
    return %arg1, %arg0, %c0_i32 : i32, i32, i32
  }
  func.func @transform_3(%arg0: i32, %arg1: i32, %arg2: i32) -> (i32, i32, i32) {
    %c0_i32 = arith.constant 0 : i32
    %c0_i32_0 = arith.constant 0 : i32
    %c0_i32_1 = arith.constant 0 : i32
    return %arg1, %c0_i32, %c0_i32_0 : i32, i32, i32
  }
  func.func @transform_4(%arg0: i32, %arg1: i32, %arg2: i32) -> (i32, i32) {
    %c0_i32 = arith.constant 0 : i32
    %c0_i32_0 = arith.constant 0 : i32
    %c0_i32_1 = arith.constant 0 : i32
    return %c0_i32, %c0_i32_0 : i32, i32
  }
  func.func @transform_5(%arg0: i32, %arg1: i32, %arg2: i32) -> (i32, i32) {
    %c0_i32 = arith.constant 0 : i32
    %c0_i32_0 = arith.constant 0 : i32
    return %arg0, %c0_i32 : i32, i32
  }
}

</mosaic_0001>

<bundles_post_ra>
// kernel: tpu_custom_call.1
= control target key start
LH: loop header
LB: loop body
LE: loop exit
PB: predicated region body
PF: predicated region fallthrough
CT: control target
= control target key end

     0   :  { %10 = vsyncpa [#allocation4], 0  ;;  %s334_s0 = inlined_call_operand.vmem [shape: bf16[1,16,16], index: 0, kind: input, shape index: {}]   ;;  %s335_s1 = inlined_call_operand.vmem [shape: bf16[1,16,128], index: 1, kind: input, shape index: {}]   ;;  %s336_s2 = inlined_call_operand.vmem [shape: f32[1,16,1], index: 2, kind: input, shape index: {}]   ;;  %s337_s3 = inlined_call_operand.hbm [shape: f32[1,128,128], index: 3, kind: input, shape index: {}]   ;;  %s338_s4 = inlined_call_operand.vmem [shape: f32[1,128], index: 4, kind: input, shape index: {}]   ;;  %s339_s5 = inlined_call_operand.hbm [shape: f32[16,128], index: 5, kind: output, shape index: {}]  }
   0x1   :  { %11 = vsyncpa [#allocation5], 0  ;;  %s22_s20 = sshll.u32 %s337_s3, 4  ;;  %s272_s21 = smov [#allocation3]   ;;  %s23_s20 = int_to_ptr.hbm [resolvable:$true] %s22_s20 }
   0x2   :  { %s24_s22 = sshll.u32 %s272_s21, 4  ;;  %s273_s23 = smov 128   ;;  %s25_s22 = int_to_ptr.vmem [resolvable:$true] %s24_s22 }
   0x3   :  { %s274_s24 = smov 8  }
   0x4   :  { %30 = dma.hbm_to_vmem [thread:$0]  %s23_s20, 2048, %s25_s22, [#allocation4], %s273_s23, %s273_s23, %s274_s24  }
   0x5   :  { %268 = dma.done.wait [#allocation4], 2048  }
   0x6   :  { %269 = vsyncadd [#allocation4], 4294965248  ;;  %v275_v0 = vmov 0   ;;  %v195_v1 = vld [vmem:[%s335_s1] sm:$0xff]  ;;  %v98_v2 = vld [vmem:[%s336_s2 + $0x8] sm:$0xff]  ;;  %vm68_vm0 = vcmask 130048  }
   0x7   :  { %218 = vset.pattern.permute.xlu0 %v275_v0  ;;  %v194_v3 = vld [vmem:[%s334_s0] sm:$0xff]  ;;  %v126_v4 = vld [vmem:[#allocation3 + $0x78] sm:$0xff]  ;;  %v125_v5 = vld [vmem:[#allocation3 + $0x70] sm:$0xff]  ;;  %79 = vmatpush.bf16.msra.mxu0 %v195_v1  ;;  %s276_s6 = smov [#allocation6]   ;;  %s172_s10 = sshll.u32 %s339_s5, 4  ;;  %s173_s10 = int_to_ptr.hbm [resolvable:$true] %s172_s10 }
   0x8   :  { %106 = vperm.xlu0 %218, %v98_v2   ;;  %127 = vmatpush.msra.mxu1 %v126_v4  ;;  %v124_v6 = vld [vmem:[#allocation3 + $0x68] sm:$0xff]  ;;  %v123_v7 = vld [vmem:[#allocation3 + $0x60] sm:$0xff]  ;;  %v122_v9 = vld [vmem:[#allocation3 + $0x58] sm:$0xff]  ;;  %s170_s7 = sshll.u32 %s276_s6, 4  ;;  %s171_s7 = int_to_ptr.vmem [resolvable:$true] %s170_s7 }
   0x9   :  { %196 = vmatpush.msra.mxu2 %v126_v4  ;;  %v97_v8 = vld [vmem:[%s336_s2] sm:$0xff]  ;;  %v121_v10 = vld [vmem:[#allocation3 + $0x50] sm:$0xff]  ;;  %v120_v11 = vld [vmem:[#allocation3 + $0x48] sm:$0xff] }
   0xa   :  { %128 = vmatpush.msra.mxu1 %v125_v5  ;;  %193 = vmatmul.msk.bf16.vlgmr.msra.gmra.mxu0 %vm68_vm0, %v194_v3  ;;  %v119_v12 = vld [vmem:[#allocation3 + $0x40] sm:$0xff]  ;;  %v118_v13 = vld [vmem:[#allocation3 + $0x38] sm:$0xff]  ;;  %v117_v14 = vld [vmem:[#allocation3 + $0x30] sm:$0xff] }
   0xb   :  { %197 = vmatpush.msra.mxu2 %v125_v5  ;;  %v116_v15 = vld [vmem:[#allocation3 + $0x28] sm:$0xff]  ;;  %v115_v16 = vld [vmem:[#allocation3 + $0x20] sm:$0xff]  ;;  %v114_v17 = vld [vmem:[#allocation3 + $0x18] sm:$0xff] }
   0xc   :  { %129 = vmatpush.msra.mxu1 %v124_v6  ;;  %v113_v18 = vld [vmem:[#allocation3 + $0x10] sm:$0xff]  ;;  %v112_v19 = vld [vmem:[#allocation3 + $0x8] sm:$0xff]  ;;  %v111_v20 = vld [vmem:[#allocation3] sm:$0xff] }
   0xd   :  { %198 = vmatpush.msra.mxu2 %v124_v6  ;;  %v219_v27 = vld [vmem:[%s338_s4] ss:$0 sm:$0xff] }
   0xe   :  { %130 = vmatpush.msra.mxu1 %v123_v7 }
   0xf   :  { %199 = vmatpush.msra.mxu2 %v123_v7 }
  0x10   :  { %101 = vperm.xlu0 %218, %v97_v8   ;;  %131 = vmatpush.msra.mxu1 %v122_v9 }
  0x11   :  { %200 = vmatpush.msra.mxu2 %v122_v9 }
  0x12   :  { %132 = vmatpush.msra.mxu1 %v121_v10 }
  0x13   :  { %201 = vmatpush.msra.mxu2 %v121_v10 }
  0x14   :  { %133 = vmatpush.msra.mxu1 %v120_v11 }
  0x15   :  { %202 = vmatpush.msra.mxu2 %v120_v11 }
  0x16   :  { %134 = vmatpush.msra.mxu1 %v119_v12 }
  0x17   :  { %203 = vmatpush.msra.mxu2 %v119_v12 }
  0x18   :  { %135 = vmatpush.msra.mxu1 %v118_v13 }
  0x19   :  { %204 = vmatpush.msra.mxu2 %v118_v13 }
  0x1a   :  { %136 = vmatpush.msra.mxu1 %v117_v14 }
  0x1b   :  { %205 = vmatpush.msra.mxu2 %v117_v14 }
  0x1c   :  { %137 = vmatpush.msra.mxu1 %v116_v15 }
  0x1d   :  { %206 = vmatpush.msra.mxu2 %v116_v15 }
  0x1e   :  { %138 = vmatpush.msra.mxu1 %v115_v16 }
  0x1f   :  { %207 = vmatpush.msra.mxu2 %v115_v16 }
  0x20   :  { %139 = vmatpush.msra.mxu1 %v114_v17 }
  0x21   :  { %208 = vmatpush.msra.mxu2 %v114_v17 }
  0x22   :  { %140 = vmatpush.msra.mxu1 %v113_v18 }
  0x23   :  { %209 = vmatpush.msra.mxu2 %v113_v18 }
  0x24   :  { %141 = vmatpush.msra.mxu1 %v112_v19 }
  0x25   :  { %210 = vmatpush.msra.mxu2 %v112_v19 }
  0x26   :  { %142 = vmatpush.msra.mxu1 %v111_v20 }
  0x27   :  { %211 = vmatpush.msra.mxu2 %v111_v20 }
  0x7a   :  { %v107_v21 = vpop.permute.xlu0 %106 }
  0x82   :  { %v102_v22 = vpop.permute.xlu0 %101 }
  0x87   :  { %v81_v23 = vpop.f32.mrf.mxu0 }
  0x88   :  { %v109_v24 = vmul.f32 %v102_v22, %v81_v23 }
  0x8a   :  { %143 = vmatmul.f32.vlgmr.msra.gmra.mxu1 %v109_v24 }
  0x8f   :  { %v83_v25 = vpop.f32.mrf.mxu0 }
  0x90   :  { %v110_v26 = vmul.f32 %v107_v21, %v83_v25 }
  0x92   :  { %146 = vmatmul.f32.vlgmr.msra.gmra.mxu2 %v110_v26 }
 0x107   :  { %v144_v28 = vpop.f32.mrf.mxu1 }
 0x108   :  { %v162_v29 = vadd.f32 %v219_v27, %v144_v28 }
 0x10a   :  { %164 = vst [vmem:[#allocation6] sm:$0xff] %v162_v29 }
 0x115   :  { %v147_v30 = vpop.f32.mrf.mxu2 }
 0x116   :  { %v163_v31 = vadd.f32 %v219_v27, %v147_v30 }
 0x118   :  { %165 = vst [vmem:[#allocation6 + $0x8] sm:$0xff] %v163_v31 }
 0x119   :  { %178 = dma.vmem_to_hbm [thread:$0]  %s171_s7, 256, %s173_s10, [#allocation5], %s273_s23, %s273_s23, %s274_s24  }
 0x11a   :  { %270 = dma.done.wait [#allocation5], 256  }
 0x11b   :  { %271 = vsyncadd [#allocation5], 4294967040 }
 0x11c   :  { %183 = vsyncpa [#allocation4], 1 }
 0x11d   :  { %184 = vsyncpa [#allocation5], 1 }

</bundles_post_ra>
